<compile_context>
chip_gen: v7x
topology: tpu7x:2x2x1
jax: 0.10.0
libtpu: 0.0.40
codegen_flags: <defaults>
</compile_context>

<pallas_src>
import functools

import jax
import jax.numpy as jnp
from jax.experimental import pallas as pl
from jax.experimental.pallas import tpu as pltpu

GAMMA = 0.1   # AntiSymmetricConv default
EPS = 0.1     # AntiSymmetricConv default


def _round_up(x, m):
    return (x + m - 1) // m * m


def _vmem_capacity_bytes():
    """Physical VMEM per TensorCore; conservative 64 MiB (v7x) if unknown."""
    try:
        info = pltpu.get_tpu_info()
        for name in ("vmem_capacity_bytes", "vmem_bytes", "vmem_capacity"):
            v = getattr(info, name, None)
            if v:
                return int(v)
    except Exception:
        pass
    return 64 * 1024 * 1024


def _vmem_need_bytes(tn, n_pad, c, k_pad, adj_bufs, const_bufs):
    """Worst-case VMEM footprint estimate (bytes) for one grid step."""
    b = adj_bufs * tn * n_pad * 2                 # bf16 adjacency row tiles
    b += const_bufs * n_pad * c * 2               # x @ W_rel, bf16, grid-invariant
    b += const_bufs * (c * c + c * k_pad) * 4     # folded weight + lin2 weight
    b += const_bufs * 2 * 8 * max(128, k_pad) * 4  # biases (tile-padded)
    b += 2 * tn * c * (4 + 4)                     # f32 x tile + i32 dropout bits
    b += 2 * tn * k_pad * 2                       # bf16 output tile
    return b


def _choose_tiling(n, c, k_pad, tile_rows, budget):
    """Pick row-tile size (multiple of 16 for bf16 sublanes) that fits VMEM."""
    req = 512 if tile_rows is None else tile_rows
    req = max(16, min(_round_up(req, 16), _round_up(n, 16)))
    cands, t = [], req
    while t >= 16:
        if t not in cands:
            cands.append(t)
        t = max(16, (t // 2) // 16 * 16) if t > 16 else 0
    for tn in cands:
        n_pad = _round_up(n, tn)
        if _vmem_need_bytes(tn, n_pad, c, k_pad, 3, 2) <= budget:
            return tn, n_pad, 3          # room for a 3-deep adjacency pipeline
        if _vmem_need_bytes(tn, n_pad, c, k_pad, 2, 2) <= budget:
            return tn, n_pad, 2
    tn = 16
    return tn, _round_up(n, tn), 2


def antisymmetric_kernel(bits_ref, xrel_ref, x_tile_ref, adj_ref,
                         wcomb_ref, bcomb_ref, wlin_ref, blin_ref,
                         out_ref, *, dropout_p, keep_threshold):
    x_tile = x_tile_ref[...]                                    # (TN, C) f32

    # GraphConv aggregation on pre-transformed features:
    # (A @ x) @ W_rel == A @ (x @ W_rel); bf16 operands, f32 accumulation.
    h = jnp.dot(adj_ref[...], xrel_ref[...],
                preferred_element_type=jnp.float32)             # (TN, C)
    # lin_root + folded anti-symmetric term + folded bias.
    h = h + jnp.dot(x_tile, wcomb_ref[...], preferred_element_type=jnp.float32)
    h = h + bcomb_ref[...]
    x_new = x_tile + EPS * jnp.tanh(h)

    # Dropout (F.dropout defaults to training=True): threshold compare on
    # precomputed per-node random bits.
    if dropout_p > 0.0:
        keep = bits_ref[...] >= jnp.int32(keep_threshold)
        x_new = jnp.where(keep, x_new * (1.0 / (1.0 - dropout_p)), 0.0)
        # TODO(synk): RNG stream differs from torch.nn.functional.dropout; the
        # keep probability (1-p) and the 1/(1-p) scaling match.

    # lin2 + sigmoid; class dim padded to 128 -> lane-dense, unmasked store.
    logits = jnp.dot(x_new, wlin_ref[...], preferred_element_type=jnp.float32)
    logits = logits + blin_ref[...]
    out_ref[...] = jax.nn.sigmoid(logits).astype(out_ref.dtype)


def antisymmetric_forward(embed_w, adj, params, *, dropout_p, seed,
                          tile_rows=None):
    n, c = embed_w.shape
    k = params["wlin"].shape[1]
    k_pad = _round_up(max(k, 128), 128)

    capacity = _vmem_capacity_bytes()
    tn, n_pad, adj_bufs = _choose_tiling(n, c, k_pad, tile_rows,
                                         int(0.85 * capacity))
    need = _vmem_need_bytes(tn, n_pad, c, k_pad, adj_bufs, 2)
    vmem_limit = int(min(0.92 * capacity, max(32 * 2 ** 20, need + (4 << 20))))

    # ---- parameter folds (data-independent, once, outside the kernel) ----
    w = params["w"]
    w_comb = (params["wroot"] + w.T - w
              - GAMMA * jnp.eye(c, dtype=jnp.float32))           # [in, out]
    b_comb = params["brel"] + params["bconv"]                    # (1, C)

    # ---- operand prep: padding, lane-dense class dim, hoisted casts ----
    x_p = jnp.zeros((n_pad, c), jnp.float32).at[:n].set(embed_w)
    # Pre-transform features once: x_rel = x @ W_rel, cast to bf16 here (not
    # per grid step inside the kernel).
    x_rel = jnp.zeros((n_pad, c), jnp.float32).at[:n].set(
        embed_w @ params["wrel"]).astype(jnp.bfloat16)
    adj_p = jnp.zeros((n_pad, n_pad), jnp.float32).at[:n, :n].set(adj)
    adj_p = adj_p.astype(jnp.bfloat16)       # small integer edge counts -> exact
    wlin_p = jnp.zeros((c, k_pad), jnp.float32).at[:, :k].set(params["wlin"])
    blin_p = jnp.zeros((1, k_pad), jnp.float32).at[:, :k].set(params["blin"])

    # Per-node random bits in [0, 2**31) for the dropout keep mask.
    bits = jax.random.bits(jax.random.PRNGKey(seed), (n_pad, c), jnp.uint32)
    bits = (bits >> 1).astype(jnp.int32)
    keep_threshold = min(int(round(dropout_p * 2.0 ** 31)), 2 ** 31 - 1)

    cost = pl.CostEstimate(
        flops=2 * n_pad * n_pad * c + 2 * n_pad * c * c + 2 * n_pad * c * k_pad,
        transcendentals=n_pad * (c + k_pad),
        bytes_accessed=(n_pad * n_pad * 2 + n_pad * c * (2 + 4 + 4)
                        + n_pad * k_pad * 2 + (c * c + c * k_pad) * 4),
    )

    def spec(shape, index_map, buffers=None):
        if buffers is not None and hasattr(pl, "Buffered"):
            try:
                return pl.BlockSpec(shape, index_map,
                                    pipeline_mode=pl.Buffered(buffers))
            except TypeError:
                pass
        return pl.BlockSpec(shape, index_map)

    def build(custom_buffering):
        cb = 1 if custom_buffering else None        # grid-invariant operands
        ab = adj_bufs if custom_buffering else None  # adjacency stream depth
        return pl.pallas_call(
            functools.partial(antisymmetric_kernel, dropout_p=dropout_p,
                              keep_threshold=keep_threshold),
            out_shape=jax.ShapeDtypeStruct((n_pad, k_pad), jnp.bfloat16),
            grid=(n_pad // tn,),
            in_specs=[
                spec((tn, c), lambda i: (i, 0)),           # dropout bits tile
                spec((n_pad, c), lambda i: (0, 0), cb),    # x @ W_rel (bf16, resident)
                spec((tn, c), lambda i: (i, 0)),           # x row tile (f32)
                spec((tn, n_pad), lambda i: (i, 0), ab),   # adjacency rows (HBM stream)
                spec((c, c), lambda i: (0, 0), cb),        # folded W_root + (W.T-W-gI)
                spec((1, c), lambda i: (0, 0), cb),        # folded bias
                spec((c, k_pad), lambda i: (0, 0), cb),    # lin2 weight (lane-dense)
                spec((1, k_pad), lambda i: (0, 0), cb),    # lin2 bias
            ],
            out_specs=pl.BlockSpec((tn, k_pad), lambda i: (i, 0)),
            compiler_params=pltpu.CompilerParams(
                # Independent row tiles shard across TensorCores (v7x megacore).
                dimension_semantics=("parallel",),
                vmem_limit_bytes=vmem_limit,
            ),
            cost_estimate=cost,
        )

    args = (bits, x_rel, x_p, adj_p, w_comb, b_comb, wlin_p, blin_p)
    try:
        out = build(True)(*args)
    except Exception:
        # pipeline_mode / Buffered unsupported by this JAX: default buffering.
        out = build(False)(*args)
    return out[:n, :k].astype(jnp.float32)


if __name__ == "__main__":
    # Small, forward-consistent shapes.
    NUM_NODES = 64        # num_nodes  (embedding rows, graph size)
    EMBED = 32            # embed_channels
    NUM_CLASSES = 8       # num_classes
    NUM_EDGES = 256
    DROPOUT = 0.25

    key = jax.random.PRNGKey(0)
    ks = jax.random.split(key, 10)

    # nn.Embedding(num_nodes, embed_channels).weight ~ N(0, 1)
    embed_w = jax.random.normal(ks[0], (NUM_NODES, EMBED), jnp.float32)

    # edge_index [2, E] -> dense adjacency A[i, j] = #edges j -> i
    src = jax.random.randint(ks[1], (NUM_EDGES,), 0, NUM_NODES)
    tgt = jax.random.randint(ks[2], (NUM_EDGES,), 0, NUM_NODES)
    edge_index = jnp.stack([src, tgt])                      # [2, E]
    adj = jnp.zeros((NUM_NODES, NUM_NODES), jnp.float32).at[tgt, src].add(1.0)

    # Deterministic parameter init (all weights stored [in, out]).
    s = 0.1
    params = dict(
        w=s * jax.random.normal(ks[3], (EMBED, EMBED), jnp.float32),
        wrel=s * jax.random.normal(ks[4], (EMBED, EMBED), jnp.float32),
        brel=s * jax.random.normal(ks[5], (1, EMBED), jnp.float32),
        wroot=s * jax.random.normal(ks[6], (EMBED, EMBED), jnp.float32),
        bconv=s * jax.random.normal(ks[7], (1, EMBED), jnp.float32),
        wlin=s * jax.random.normal(ks[8], (EMBED, NUM_CLASSES), jnp.float32),
        blin=s * jax.random.normal(ks[9], (1, NUM_CLASSES), jnp.float32),
    )

    # tile_rows=32 -> grid=(2,), exercising the pipelined / parallel row tiling.
    out = antisymmetric_forward(embed_w, adj, params,
                                dropout_p=DROPOUT, seed=1234, tile_rows=32)
    out = jax.block_until_ready(out)

    assert out.shape == (NUM_NODES, NUM_CLASSES), out.shape
    assert bool(jnp.all(jnp.isfinite(out)))
    assert bool(jnp.all((out >= 0.0) & (out <= 1.0)))   # sigmoid range
    print("KERNEL_OK")
</pallas_src>

<mosaic_0001>
module attributes {stable_mosaic.version = 11 : i64} {
  func.func @antisymmetric_kernel(%arg0: i32, %arg1: memref<32x32xi32, #tpu.memory_space<vmem>>, %arg2: memref<64x32xbf16, #tpu.memory_space<vmem>>, %arg3: memref<32x32xf32, #tpu.memory_space<vmem>>, %arg4: memref<32x64xbf16, #tpu.memory_space<vmem>>, %arg5: memref<32x32xf32, #tpu.memory_space<vmem>>, %arg6: memref<1x32xf32, #tpu.memory_space<vmem>>, %arg7: memref<32x128xf32, #tpu.memory_space<vmem>>, %arg8: memref<1x128xf32, #tpu.memory_space<vmem>>, %arg9: memref<32x128xbf16, #tpu.memory_space<vmem>>) attributes {dimension_semantics = [#tpu.dimension_semantics<parallel>], iteration_bounds = array<i64: 2>, scalar_prefetch = 0 : i64, scratch_operands = 0 : i64, tpu.core_type = #tpu.core_type<tc>, window_params = [{transform_indices = @transform_0, window_bounds = array<i64: 32, 32>}, {pipeline_mode = #tpu.pipeline_mode<synchronous>, transform_indices = @transform_1, window_bounds = array<i64: 64, 32>}, {transform_indices = @transform_2, window_bounds = array<i64: 32, 32>}, {transform_indices = @transform_3, window_bounds = array<i64: 32, 64>}, {pipeline_mode = #tpu.pipeline_mode<synchronous>, transform_indices = @transform_4, window_bounds = array<i64: 32, 32>}, {pipeline_mode = #tpu.pipeline_mode<synchronous>, transform_indices = @transform_5, window_bounds = array<i64: 1, 32>}, {pipeline_mode = #tpu.pipeline_mode<synchronous>, transform_indices = @transform_6, window_bounds = array<i64: 32, 128>}, {pipeline_mode = #tpu.pipeline_mode<synchronous>, transform_indices = @transform_7, window_bounds = array<i64: 1, 128>}, {transform_indices = @transform_8, window_bounds = array<i64: 32, 128>}]} {
    %c0 = arith.constant 0 : index
    %c0_0 = arith.constant 0 : index
    %0 = vector.load %arg3[%c0, %c0_0] : memref<32x32xf32, #tpu.memory_space<vmem>>, vector<32x32xf32>
    %c0_1 = arith.constant 0 : index
    %c0_2 = arith.constant 0 : index
    %1 = vector.load %arg4[%c0_1, %c0_2] : memref<32x64xbf16, #tpu.memory_space<vmem>>, vector<32x64xbf16>
    %c0_3 = arith.constant 0 : index
    %c0_4 = arith.constant 0 : index
    %2 = vector.load %arg2[%c0_3, %c0_4] : memref<64x32xbf16, #tpu.memory_space<vmem>>, vector<64x32xbf16>
    %cst = arith.constant dense<0.000000e+00> : vector<32x32xf32>
    %3 = tpu.matmul %1, %2, %cst {dimension_numbers = #tpu.dot_dimension_numbers<[1], [0], [0], [1], [0, 0, 1, 1], [], []>} : vector<32x64xbf16>, vector<64x32xbf16>, vector<32x32xf32> -> vector<32x32xf32>
    %c0_5 = arith.constant 0 : index
    %c0_6 = arith.constant 0 : index
    %4 = vector.load %arg5[%c0_5, %c0_6] : memref<32x32xf32, #tpu.memory_space<vmem>>, vector<32x32xf32>
    %cst_7 = arith.constant dense<0.000000e+00> : vector<32x32xf32>
    %5 = tpu.matmul %0, %4, %cst_7 {dimension_numbers = #tpu.dot_dimension_numbers<[1], [0], [0], [1], [0, 0, 1, 1], [], []>} : vector<32x32xf32>, vector<32x32xf32>, vector<32x32xf32> -> vector<32x32xf32>
    %6 = arith.addf %3, %5 : vector<32x32xf32>
    %c0_8 = arith.constant 0 : index
    %c0_9 = arith.constant 0 : index
    %7 = vector.load %arg6[%c0_8, %c0_9] : memref<1x32xf32, #tpu.memory_space<vmem>>, vector<1x32xf32>
    %8 = vector.broadcast %7 : vector<1x32xf32> to vector<32x32xf32>
    %9 = arith.addf %6, %8 : vector<32x32xf32>
    %10 = math.tanh %9 : vector<32x32xf32>
    %cst_10 = arith.constant 1.000000e-01 : f32
    %11 = vector.broadcast %cst_10 : f32 to vector<32x32xf32>
    %12 = arith.mulf %11, %10 : vector<32x32xf32>
    %13 = arith.addf %0, %12 : vector<32x32xf32>
    %c0_11 = arith.constant 0 : index
    %c0_12 = arith.constant 0 : index
    %14 = vector.load %arg1[%c0_11, %c0_12] : memref<32x32xi32, #tpu.memory_space<vmem>>, vector<32x32xi32>
    %c536870912_i32 = arith.constant 536870912 : i32
    %15 = vector.broadcast %c536870912_i32 : i32 to vector<32x32xi32>
    %16 = arith.cmpi sge, %14, %15 : vector<32x32xi32>
    %cst_13 = arith.constant 1.33333337 : f32
    %17 = vector.broadcast %cst_13 : f32 to vector<32x32xf32>
    %18 = arith.mulf %13, %17 : vector<32x32xf32>
    %cst_14 = arith.constant 0.000000e+00 : f32
    %19 = vector.broadcast %cst_14 : f32 to vector<32x32xf32>
    %20 = arith.select %16, %18, %19 : vector<32x32xi1>, vector<32x32xf32>
    %c0_15 = arith.constant 0 : index
    %c0_16 = arith.constant 0 : index
    %21 = vector.load %arg7[%c0_15, %c0_16] : memref<32x128xf32, #tpu.memory_space<vmem>>, vector<32x128xf32>
    %cst_17 = arith.constant dense<0.000000e+00> : vector<32x128xf32>
    %22 = tpu.matmul %20, %21, %cst_17 {dimension_numbers = #tpu.dot_dimension_numbers<[1], [0], [0], [1], [0, 0, 1, 1], [], []>} : vector<32x32xf32>, vector<32x128xf32>, vector<32x128xf32> -> vector<32x128xf32>
    %c0_18 = arith.constant 0 : index
    %c0_19 = arith.constant 0 : index
    %23 = vector.load %arg8[%c0_18, %c0_19] : memref<1x128xf32, #tpu.memory_space<vmem>>, vector<1x128xf32>
    %24 = vector.broadcast %23 : vector<1x128xf32> to vector<32x128xf32>
    %25 = arith.addf %22, %24 : vector<32x128xf32>
    %26 = arith.negf %25 : vector<32x128xf32>
    %27 = math.exp %26 : vector<32x128xf32>
    %cst_20 = arith.constant 1.000000e+00 : f32
    %28 = vector.broadcast %cst_20 : f32 to vector<32x128xf32>
    %29 = arith.addf %28, %27 : vector<32x128xf32>
    %30 = arith.divf %28, %29 : vector<32x128xf32>
    %31 = arith.truncf %30 : vector<32x128xf32> to vector<32x128xbf16>
    %c0_21 = arith.constant 0 : index
    %c0_22 = arith.constant 0 : index
    %32 = vector.load %arg9[%c0_21, %c0_22] : memref<32x128xbf16, #tpu.memory_space<vmem>>, vector<32x128xbf16>
    tpu.vector_store %arg9[%c0_21, %c0_22], %31 {strides = array<i32>} : memref<32x128xbf16, #tpu.memory_space<vmem>>, vector<32x128xbf16>,
    return
  }
  func.func @transform_0(%arg0: i32) -> (i32, i32) {
    %c0_i32 = arith.constant 0 : i32
    %c0_i32_0 = arith.constant 0 : i32
    return %arg0, %c0_i32 : i32, i32
  }
  func.func @transform_1(%arg0: i32) -> (i32, i32) {
    %c0_i32 = arith.constant 0 : i32
    %c0_i32_0 = arith.constant 0 : i32
    %c0_i32_1 = arith.constant 0 : i32
    return %c0_i32, %c0_i32_0 : i32, i32
  }
  func.func @transform_2(%arg0: i32) -> (i32, i32) {
    %c0_i32 = arith.constant 0 : i32
    %c0_i32_0 = arith.constant 0 : i32
    return %arg0, %c0_i32 : i32, i32
  }
  func.func @transform_3(%arg0: i32) -> (i32, i32) {
    %c0_i32 = arith.constant 0 : i32
    %c0_i32_0 = arith.constant 0 : i32
    return %arg0, %c0_i32 : i32, i32
  }
  func.func @transform_4(%arg0: i32) -> (i32, i32) {
    %c0_i32 = arith.constant 0 : i32
    %c0_i32_0 = arith.constant 0 : i32
    %c0_i32_1 = arith.constant 0 : i32
    return %c0_i32, %c0_i32_0 : i32, i32
  }
  func.func @transform_5(%arg0: i32) -> (i32, i32) {
    %c0_i32 = arith.constant 0 : i32
    %c0_i32_0 = arith.constant 0 : i32
    %c0_i32_1 = arith.constant 0 : i32
    return %c0_i32, %c0_i32_0 : i32, i32
  }
  func.func @transform_6(%arg0: i32) -> (i32, i32) {
    %c0_i32 = arith.constant 0 : i32
    %c0_i32_0 = arith.constant 0 : i32
    %c0_i32_1 = arith.constant 0 : i32
    return %c0_i32, %c0_i32_0 : i32, i32
  }
  func.func @transform_7(%arg0: i32) -> (i32, i32) {
    %c0_i32 = arith.constant 0 : i32
    %c0_i32_0 = arith.constant 0 : i32
    %c0_i32_1 = arith.constant 0 : i32
    return %c0_i32, %c0_i32_0 : i32, i32
  }
  func.func @transform_8(%arg0: i32) -> (i32, i32) {
    %c0_i32 = arith.constant 0 : i32
    %c0_i32_0 = arith.constant 0 : i32
    return %arg0, %c0_i32 : i32, i32
  }
}

</mosaic_0001>

<bundles_post_ra>
// kernel: tpu_custom_call.1
= control target key start
LH: loop header
LB: loop body
LE: loop exit
PB: predicated region body
PF: predicated region fallthrough
CT: control target
= control target key end

     0   :  { %13 = vsyncpa [#allocation3], 0  ;;  %s1344_s0 = inlined_call_operand.vmem [shape: s32[64,32], index: 0, kind: input, shape index: {}]   ;;  %s1345_s1 = inlined_call_operand.vmem [shape: bf16[64,32], index: 1, kind: input, shape index: {}]   ;;  %s1346_s2 = inlined_call_operand.vmem [shape: f32[64,32], index: 2, kind: input, shape index: {}]   ;;  %s1347_s3 = inlined_call_operand.vmem [shape: bf16[64,64], index: 3, kind: input, shape index: {}]   ;;  %s1348_s4 = inlined_call_operand.vmem [shape: f32[32,32], index: 4, kind: input, shape index: {}]   ;;  %s1349_s5 = inlined_call_operand.vmem [shape: f32[1,32], index: 5, kind: input, shape index: {}]   ;;  %s1350_s6 = inlined_call_operand.vmem [shape: f32[32,128], index: 6, kind: input, shape index: {}]   ;;  %s1351_s7 = inlined_call_operand.vmem [shape: f32[1,128], index: 7, kind: input, shape index: {}]   ;;  %s1352_s8 = inlined_call_operand.hbm [shape: bf16[64,128], index: 8, kind: output, shape index: {}]  }
   0x1   :  { %15 = vsyncpa [#allocation3 + $0x1], 0  ;;  %s1170_s27 = smov 0   ;;  %s1172_s28 = smov 0  }
   0x2   :  { %s1174_s29 = smov 0   ;;  %s1176_s30 = smov 0  }
   0x3 LB: > { %s1191_s9 = sadd.s32 4294967295, %s1120_s30   ;;  %s851_s10 = sadd.s32 4294967294, %s1120_s30   ;;  %s1120_s30 = sphi %s1176_s30, %s1358_s30   ;;  %s1116_s29 = sphi %s1174_s29, %s1357_s29   ;;  %s1112_s28 = sphi %s1172_s28, %s1356_s28   ;;  %s1108_s27 = sphi %s1170_s27, %s1355_s27  }
   0x4   : > { %s1195_s11 = sadd.s32 1, %s1120_s30   ;;  %s211_s12 = sadd.s32 1, %s1116_s29 }
   0x5   : > { %s208_s13 = ssub.s32 %s1120_s30, %s1195_s11  ;;  %p221_p0 = scmp.ne.s32.totalorder %s1116_s29, %s1112_s28 }
   0x6   : > { %p209_p1 = scmp.eq.s32.totalorder %s208_s13, 0  ;;  %p222_p2 = scmp.eq.s32.totalorder %s1191_s9, 1 }
   0x7   : > { %p227_p3 = scmp.ne.s32.totalorder %s1112_s28, %s1108_s27  ;;  %p228_p4 = scmp.eq.s32.totalorder %s851_s10, 1 }
   0x8   : > { %s1206_s14 = scalar_select %p209_p1, %s1116_s29, %s211_s12  }
   0x9   : > { %p1208_p5 = por %p222_p2, %p221_p0  ;;  %p1212_p6 = por %p228_p4, %p227_p3 }
   0xa   : > { %p854_p7 = scmp.ge.s32.totalorder %s1120_s30, 1  ;;  %p288_p8 = scmp.lt.s32.totalorder %s1120_s30, 3 }
   0xc   : > { %p289_p9 = pnand %p854_p7, %p288_p8 }
   0xd   : > { %v1028_v0 = vld [vmem:[%s1345_s1] sm:$0xff] (!%p289_p9)   ;;  %s856_s19 = sshll.u32 (!%p289_p9), %s1191_s9, 2  ;;  %v369_v2 = vld [vmem:[%s1348_s4 + $0x8] sm:$0xff] (!%p289_p9)  ;;  %v370_v5 = vld [vmem:[%s1348_s4 + $0x10] sm:$0xff] (!%p289_p9)  ;;  %vm372_vm0 = vcmask (!%p289_p9), 261120   ;;  %vm504_vm1 = vcmask (!%p289_p9), 523264  }
   0xe   : > { %292 = sbr.rel (%p289_p9) target bundleno = 530 (0x212), region = 52  ;;  %v368_v1 = vld [vmem:[%s1348_s4] sm:$0xff] (!%p289_p9)  ;;  %p333_p10 = scmp.lt.s32.totalorder (!%p289_p9), %s856_s19, 7  ;;  %945 = vmatprep.subr.bf16.mxu1 (!%p289_p9), %v1028_v0  ;;  %v1029_v4 = vld [vmem:[%s1345_s1 + $0x8] sm:$0xff] (!%p289_p9)   ;;  %v371_v6 = vld [vmem:[%s1348_s4 + $0x18] sm:$0xff] (!%p289_p9) }
   0xf   : > { %v971_v3 = vpack.c.bf16 (!%p289_p9), %v369_v2, %v368_v1  ;;  %946 = vmatpush3.bf16.msra.mxu1 (!%p289_p9), %v1028_v0  ;;  %v975_v7 = vpack.c.bf16 (!%p289_p9), %v371_v6, %v370_v5  ;;  %v1030_v8 = vld [vmem:[%s1345_s1 + $0x10] sm:$0xff] (!%p289_p9)   ;;  %v1031_v10 = vld [vmem:[%s1345_s1 + $0x18] sm:$0xff] (!%p289_p9)   ;;  %v599_v16 = vld [vmem:[%s1350_s6] sm:$0xff] (!%p289_p9)  ;;  %s897_s23 = sshll.u32 (!%p289_p9), %s1191_s9, 8  ;;  %s1122_s17 = smov (!%p289_p9), [#allocation2]  }
  0x10   : > { %947 = vmatprep.subr.bf16.mxu1 (!%p289_p9), %v1029_v4  ;;  %v600_v17 = vld [vmem:[%s1350_s6 + $0x8] sm:$0xff] (!%p289_p9)  ;;  %v601_v19 = vld [vmem:[%s1350_s6 + $0x10] sm:$0xff] (!%p289_p9)  ;;  %v602_v20 = vld [vmem:[%s1350_s6 + $0x18] sm:$0xff] (!%p289_p9)  ;;  %s1299_s12 = scalar_lea.hbm (!%p289_p9), %s1352_s8, %s897_s23 }
  0x11   : > { %972 = vmatprep.subr.bf16.mxu0 (!%p289_p9), %v971_v3  ;;  %v979_v18 = vpack.c.bf16 (!%p289_p9), %v600_v17, %v599_v16  ;;  %v983_v21 = vpack.c.bf16 (!%p289_p9), %v602_v20, %v601_v19  ;;  %v874_v27 = vld [vmem:[%s1349_s5] ss:$0 sm:$0xff] (!%p289_p9) }
  0x12   : > { %974 = vmatpush3.bf16.msra.mxu0 (!%p289_p9), %v971_v3  ;;  %v875_v63 = vld [vmem:[%s1351_s7] ss:$0 sm:$0xff] (!%p289_p9) }
  0x13   : > { %976 = vmatprep.subr.bf16.mxu0 (!%p289_p9), %v975_v7  ;;  %948 = vmatpush3.bf16.msra.mxu1 (!%p289_p9), %v1029_v4 }
  0x14   : > { %949 = vmatprep.subr.bf16.mxu1 (!%p289_p9), %v1030_v8 }
  0x15   : > { %s1360_s19 = smov (!%p333_p10, %s856_s19), 7 }
  0x16   : > { %s857_s20 = sshll.u32 %s1360_s19, 3  ;;  %s861_s21 = sshll.u32 %s1360_s19, 2  ;;  %978 = vmatpush3.bf16.msra.mxu0 %v975_v7 }
  0x17   : > { %s342_s24 = scalar_lea.vmem %s1346_s2, %s857_s20  ;;  %s348_s13 = scalar_lea.vmem %s1347_s3, %s861_s21  ;;  %950 = vmatpush3.bf16.msra.mxu1 %v1030_v8  ;;  %980 = vmatprep.subr.bf16.mxu0 %v979_v18 }
  0x18   : > { %v1249_v9 = vld [vmem:[%s342_s24] sm:$0xff]  ;;  %v1259_v11 = vld [vmem:[%s342_s24 + $0x8] sm:$0xff]  ;;  %v354_v13 = vld [vmem:[%s342_s24 + $0x10] sm:$0xff]  ;;  %951 = vmatprep.subr.bf16.mxu1 %v1031_v10  ;;  %s336_s18 = scalar_lea.vmem %s1344_s0, %s857_s20  ;;  %s329_s21 = sand.u32 1, %s1112_s28  }
  0x19   : > { %939 = vmatprep.mubr.msk.f32.mxu0 %vm372_vm0, %v1249_v9  ;;  %v1032_v12 = vld [vmem:[%s348_s13] sm:$0xff]   ;;  %v355_v14 = vld [vmem:[%s342_s24 + $0x18] sm:$0xff]  ;;  %v1033_v15 = vld [vmem:[%s348_s13 + $0x8] sm:$0xff]   ;;  %s855_s22 = sshll.u32 %s329_s21, 4  ;;  %s1303_s13 = scalar_lea.sflag [#allocation3], %s329_s21 }
  0x1a   : > { %953 = vmatprep.mubr.msk.bf16.mxu1 %vm504_vm1, %v1032_v12  ;;  %940 = vmatmul.mubr.msk.f32.vlgmr.msra.gmra.mrb[0].mxu0 %vm372_vm0, %v1259_v11  ;;  %v585_v42 = vld [vmem:[%s336_s18 + $0x10] sm:$0xff]  ;;  %v583_v45 = vld [vmem:[%s336_s18] sm:$0xff]  ;;  %v586_v49 = vld [vmem:[%s336_s18 + $0x18] sm:$0xff]  ;;  %s331_s25 = scalar_lea.vmem [#allocation2], %s855_s22 }
  0x1b   : > { %942 = vmatprep.mubr.msk.f32.mxu0 %vm372_vm0, %v354_v13  ;;  %952 = vmatpush3.bf16.msra.mxu1 %v1031_v10  ;;  %v584_v52 = vld [vmem:[%s336_s18 + $0x8] sm:$0xff]  ;;  %vm589_vm2 = vcmp.ge.s32.totalorder %v585_v42, 536870912  ;;  %vm587_vm3 = vcmp.ge.s32.totalorder %v583_v45, 536870912  ;;  %vm590_vm4 = vcmp.ge.s32.totalorder %v586_v49, 536870912  ;;  %s765_s24 = sshll.u32 %s331_s25, 4  ;;  %s1062_s18 = sshll.u32 %s1122_s17, 4  ;;  %s1301_s24 = int_to_ptr.vmem [resolvable:$true] %s765_s24  ;;  %s1063_s18 = int_to_ptr.vmem [resolvable:$false] %s1062_s18 }
  0x1c   : > { %982 = vmatpush3.bf16.msra.mxu0 %v979_v18  ;;  %vm588_vm5 = vcmp.ge.s32.totalorder %v584_v52, 536870912  ;;  %s1058_s9 = scalar_lea.vmem %s1301_s24, 256  ;;  %s1064_s19 = scalar_lea.vmem %s1063_s18, 512 }
  0x1d   : > { %984 = vmatprep.subr.bf16.mxu0 %v983_v21  ;;  %p1059_p11 = scmp.ne.s32.totalorder %s1301_s24, %s1058_s9  ;;  %p1065_p0 = scmp.lt.s32.totalorder %s1301_s24, %s1063_s18 }
  0x1e   : > { %943 = vmatmul.mubr.msk.f32.gmra.mrb[2].mxu0 %vm372_vm0, %v355_v14  ;;  %954 = vmatmul.mubr.msk.bf16.vlgmr.msra.gmra.mrb[0].mxu1 %vm504_vm1, %v1033_v15  ;;  %p1066_p1 = scmp.lt.s32.totalorder %s1064_s19, %s1058_s9 }
  0x1f   : > { %p1060_p12 = pnand %p1059_p11, %p1208_p5 }
  0x20   : > { %986 = vmatpush3.bf16.msra.mxu0 %v983_v21  ;;  %p1067_p2 = por %p1066_p1, %p1065_p0 }
  0x21   : > { %p1061_p13 = pneg %p1060_p12 }
  0x23   : > { %p1068_p3 = pnand %p1067_p2, %p1061_p13 }
  0xed   : > { %v941_v22 = vpop.f32.mrb[0].mxu0 }
  0xee   : > { %v451_v23 = vpop.f32.mrb[1].mxu0 }
  0xf1   : > { %v944_v24 = vpop.f32.mrb[2].mxu0  ;;  %v955_v26 = vpop.f32.mrb[0].mxu1 }
  0xf2   : > { %v461_v25 = vpop.f32.mrb[3].mxu0  ;;  %v545_v29 = vpop.f32.mrb[1].mxu1 }
  0xf3   : > { %v554_v28 = vadd.f32 %v955_v26, %v461_v25  ;;  %v546_v30 = vadd.f32 %v545_v29, %v451_v23  ;;  %v956_v31 = vpop.f32.mrb[2].mxu1 }
  0xf4   : > { %v557_v33 = vadd.f32 %v956_v31, %v944_v24  ;;  %v548_v34 = vpop.f32.mrb[3].mxu1 }
  0xf5   : > { %v569_v32 = vadd.f32 %v874_v27, %v554_v28  ;;  %v567_v35 = vadd.f32 %v874_v27, %v546_v30  ;;  %v549_v36 = vadd.f32 %v941_v22, %v548_v34 }
  0xf6   : > { %v570_v37 = vadd.f32 %v874_v27, %v557_v33 }
  0xf7   : > { %1034 = vtanh.f32 %v569_v32  ;;  %v568_v38 = vadd.f32 %v874_v27, %v549_v36 }
  0xf8   : > { %1036 = vtanh.f32 %v567_v35 }
  0xf9   : > { %1038 = vtanh.f32 %v570_v37 }
  0xfa   : > { %1040 = vtanh.f32 %v568_v38 }
 0x101   : > { %v1035_v39 = vpop.eup %1034 }
 0x102   : > { %v1037_v40 = vpop.eup %1036  ;;  %v577_v41 = vmul.f32 0.1, %v1035_v39 }
 0x103   : > { %v1039_v43 = vpop.eup %1038  ;;  %v575_v44 = vmul.f32 0.1, %v1037_v40 }
 0x104   : > { %v1041_v46 = vpop.eup %1040  ;;  %v578_v47 = vmul.f32 0.1, %v1039_v43  ;;  %v581_v48 = vadd.f32 %v577_v41, %v354_v13 }
 0x105   : > { %v576_v50 = vmul.f32 0.1, %v1041_v46  ;;  %v579_v51 = vadd.f32 %v575_v44, %v1249_v9 }
 0x106   : > { %v593_v53 = vmul.f32 1.3333334, %v581_v48  ;;  %v582_v54 = vadd.f32 %v578_v47, %v355_v14 }
 0x107   : > { %v580_v55 = vadd.f32 %v576_v50, %v1259_v11  ;;  %v591_v56 = vmul.f32 1.3333334, %v579_v51 }
 0x108   : > { %v597_v57 = vsel %vm589_vm2, %v593_v53, 0.0  ;;  %v594_v58 = vmul.f32 1.3333334, %v582_v54 }
 0x109   : > { %v592_v59 = vmul.f32 1.3333334, %v580_v55  ;;  %v595_v60 = vsel %vm587_vm3, %v591_v56, 0.0 }
 0x10a   : > { %965 = vmatprep.mubr.msk.f32.mxu0 %vm372_vm0, %v595_v60  ;;  %v598_v61 = vsel %vm590_vm4, %v594_v58, 0.0 }
 0x10b   : > { %v596_v62 = vsel %vm588_vm5, %v592_v59, 0.0 }
 0x10c   : > { %966 = vmatmul.mubr.msk.f32.vlgmr.msra.gmra.mrb[4].mxu0 %vm372_vm0, %v596_v62 }
 0x10d   : > { %968 = vmatprep.mubr.msk.f32.mxu0 %vm372_vm0, %v597_v57 }
 0x110   : > { %969 = vmatmul.mubr.msk.f32.gmra.mrb[6].mxu0 %vm372_vm0, %v598_v61 }
 0x1df   : > { %v967_v0 = vpop.f32.mrb[4].mxu0 }
 0x1e0   : > { %v694_v1 = vadd.f32 %v967_v0, %v875_v63  ;;  %v688_v2 = vpop.f32.mrb[5].mxu0 }
 0x1e1   : > { %v689_v3 = vadd.f32 %v875_v63, %v688_v2 }
 0x1e2   : > { %v881_v4 = vmul.f32 -1.442695, %v694_v1 }
 0x1e3   : > { %v880_v5 = vmul.f32 -1.442695, %v689_v3  ;;  %v970_v6 = vpop.f32.mrb[6].mxu0 }
 0x1e4   : > { %1042 = vpow2.f32 %v881_v4  ;;  %v704_v7 = vadd.f32 %v970_v6, %v875_v63  ;;  %v698_v8 = vpop.f32.mrb[7].mxu0 }
 0x1e5   : > { %1044 = vpow2.f32 %v880_v5  ;;  %v699_v9 = vadd.f32 %v875_v63, %v698_v8 }
 0x1e6   : > { %v883_v10 = vmul.f32 -1.442695, %v704_v7 }
 0x1e7   : > { %v882_v11 = vmul.f32 -1.442695, %v699_v9 }
 0x1e8   : > { %1046 = vpow2.f32 %v883_v10 }
 0x1e9   : > { %1048 = vpow2.f32 %v882_v11 }
 0x1ee   : > { %v1043_v12 = vpop.eup %1042 }
 0x1ef   : > { %v1045_v13 = vpop.eup %1044  ;;  %v720_v14 = vadd.f32 1.0, %v1043_v12 }
 0x1f0   : > { %v719_v15 = vadd.f32 1.0, %v1045_v13 }
 0x1f1   : > { %1050 = vrcp.f32 %v720_v14 }
 0x1f2   : > { %v1047_v16 = vpop.eup %1046  ;;  %1052 = vrcp.f32 %v719_v15 }
 0x1f3   : > { %v1049_v17 = vpop.eup %1048  ;;  %v722_v18 = vadd.f32 1.0, %v1047_v16 }
 0x1f4   : > { %v721_v19 = vadd.f32 1.0, %v1049_v17 }
 0x1f5   : > { %1054 = vrcp.f32 %v722_v18 }
 0x1f6   : > { %1056 = vrcp.f32 %v721_v19 }
 0x1fb   : > { %v1051_v20 = vpop.eup %1050 }
 0x1fc   : > { %v1053_v21 = vpop.eup %1052 }
 0x1fd   : > { %v901_v22 = vpack.c.bf16 %v1051_v20, %v1053_v21 }
 0x1ff   : > { %v1055_v23 = vpop.eup %1054  ;;  %902 = vst [vmem:[%s331_s25] sm:$0xff] %v901_v22  }
 0x200   : > { %v1057_v24 = vpop.eup %1056 }
 0x201   : > { %v906_v25 = vpack.c.bf16 %v1055_v23, %v1057_v24 }
 0x203   : > { %908 = vst [vmem:[%s331_s25 + $0x8] sm:$0xff] %v906_v25  }
 0x204   : > { %1071 = shalt.err (!%p1068_p3)
}
 0x205   : > { %s1072_s20 = scalar_lea.hbm %s1299_s12, 256  ;;  %s1076_s23 = scalar_lea.hbm %s1352_s8, 512 }
 0x206   : > { %p1073_p4 = scmp.ne.s32.totalorder %s1299_s12, %s1072_s20  ;;  %p1077_p9 = scmp.lt.u32.totalorder %s1299_s12, %s1352_s8 }
 0x207   : > { %p1078_p10 = scmp.lt.u32.totalorder %s1076_s23, %s1072_s20  ;;  %p1080_p12 = scmp.lt.u32.totalorder %s1072_s20, %s1299_s12 }
 0x208   : > { %p1074_p7 = pnand %p1073_p4, %p1208_p5 }
 0x209   : > { %p1079_p11 = por %p1078_p10, %p1077_p9 }
 0x20a   : > { %p1075_p8 = pneg %p1074_p7 }
 0x20b   : > { %p1081_p13 = por %p1080_p12, %p1079_p11 }
 0x20d   : > { %p1082_p0 = pnand %p1081_p13, %p1075_p8 }
 0x20f   : > { %1085 = shalt.err (!%p1082_p0)
}
 0x210   : > { %s1123_s10 = smov 64   ;;  %s1124_s9 = smov 4  }
 0x211   : > { %987 = dma.vmem_to_hbm [thread:$0]  (%p1208_p5), %s1301_s24, 256, %s1299_s12, %s1303_s13, %s1123_s10, %s1123_s10, %s1124_s9  }
 0x212 PF: > { %p993_p1 = scmp.ge.s32.totalorder %s1120_s30, 2  ;;  %s780_s17 = sand.u32 1, %s1108_s27  }
 0x213   : > { %s781_s18 = scalar_lea.sflag [#allocation3], %s780_s17 }
 0x214   : > { %p990_p2 = pnand %p993_p1, %p1212_p6 }
 0x216   : > { %1103 = dma.done.wait (!%p990_p2), %s781_s18, 256  }
 0x217   : > { %1105 = vsyncadd (!%p990_p2), %s781_s18, 4294967040  ;;  %p18_p3 = scmp.ge.s32.totalorder %s1195_s11, 4   ;;  %s1355_s27 = smov %s1112_s28 }
 0x218   : > { %s1356_s28 = smov %s1116_s29  ;;  %s1357_s29 = smov %s1206_s14 }
 0x219   : > { %s1358_s30 = smov %s1195_s11  ;;  %20 = sbr.rel (!%p18_p3) target bundleno = 3 (0x3), region = 93 }
 0x220   :  { %786 = vsyncpa [#allocation3], 1 }
 0x221   :  { %788 = vsyncpa [#allocation3 + $0x1], 1 }

</bundles_post_ra>
